<compile_context>
chip_gen: v7x
topology: tpu7x:2x2x1
jax: 0.10.0
libtpu: 0.0.40
codegen_flags: <defaults>
</compile_context>

<pallas_src>
import numpy as np
import jax
import jax.numpy as jnp
from jax.experimental import pallas as pl
from jax.experimental.pallas import tpu as pltpu


def rise_kernel(masks_ref, w_ref, b_ref, onehot_ref, sal_ref):
    """One grid step = one chunk of masks for one saliency partition.

    masks_ref  : VMEM (NB, HW)   bf16 -- mask chunk (the only streamed operand)
    w_ref      : VMEM (HW, Kpad) bf16 -- folded classifier weight W_eff (resident)
    b_ref      : VMEM (1, Kpad)  f32  -- bias; padded lanes hold -1e9 (resident)
    onehot_ref : VMEM (1, Kpad)  f32  -- one-hot class selector (resident)
    sal_ref    : VMEM (1, HW)    f32  -- per-partition saliency accumulator
    """
    i = pl.program_id(1)  # chunk index within this partition ('arbitrary' axis)

    @pl.when(i == 0)
    def _():
        sal_ref[...] = jnp.zeros_like(sal_ref)

    masks = masks_ref[...]  # (NB, HW) bf16

    # logits = (mask * image) @ W + b with the linear model pre-folded into W_eff.
    # Native bf16 x bf16 MXU matmul, f32 accumulation.
    logits = jnp.dot(masks, w_ref[...], preferred_element_type=jnp.float32) + b_ref[...]

    # Softmax over (padded) classes; padded lanes carry a -1e9 bias -> exp == 0,
    # so they do not inflate the denominator. Class selection via the one-hot.
    m = jnp.max(logits, axis=1, keepdims=True)
    e = jnp.exp(logits - m)
    denom = jnp.sum(e, axis=1, keepdims=True)
    e_sel = jnp.sum(e * onehot_ref[...], axis=1, keepdims=True)
    prob = e_sel * pl.reciprocal(denom, approx=True)  # (NB, 1) f32, recip on EUP

    # sal += prob^T @ masks: contract over the mask-row axis directly on the MXU
    # with native bf16 operands (f32 accumulation). No f32 mask temporary.
    sal_ref[...] += jax.lax.dot_general(
        prob.astype(masks.dtype), masks,
        dimension_numbers=(((0,), (0,)), ((), ())),
        preferred_element_type=jnp.float32)


def rise_saliency(masks_flat, w_eff, b, onehot, *, p1, chunk, parts):
    """masks_flat: (N, HW) bf16, w_eff: (HW, Kpad) bf16, b/onehot: (1, Kpad) f32.

    Returns the (1, HW) f32 RISE saliency, already normalized by N and p1.
    """
    n, hw = masks_flat.shape
    k = w_eff.shape[-1]

    # Tail handling: zero-pad mask rows up to a multiple of parts * chunk.
    # A zero mask row contributes exactly nothing to sal (prob_n * 0 == 0), so
    # no in-kernel masking is needed; normalization uses the original N.
    per = parts * chunk
    n_pad = int(pl.cdiv(n, per)) * per
    if n_pad != n:
        masks_flat = jnp.pad(masks_flat, ((0, n_pad - n), (0, 0)))
    steps = n_pad // per

    partial = pl.pallas_call(
        rise_kernel,
        out_shape=jax.ShapeDtypeStruct((parts, 1, hw), jnp.float32),
        grid_spec=pltpu.PrefetchScalarGridSpec(
            num_scalar_prefetch=0,
            grid=(parts, steps),
            in_specs=[
                # masks: the only operand streamed per grid step (bf16 DMA).
                # If profiling shows exposed DMA at real sizes, deepen with
                # pipeline_mode=pl.Buffered(3) where VMEM allows.
                pl.BlockSpec((chunk, hw), lambda p, i: (p * steps + i, 0)),
                # Grid-invariant residents (constant index_map).
                # TODO(synk): at real ViT sizes (HW=224^2, K=1000) W_eff (~96 MiB
                # bf16) exceeds v7x's 64 MiB VMEM; add a K grid axis with an
                # online softmax, or split into two passes (probs, then probs^T@masks).
                pl.BlockSpec((hw, k), lambda p, i: (0, 0)),
                pl.BlockSpec((1, k), lambda p, i: (0, 0)),
                pl.BlockSpec((1, k), lambda p, i: (0, 0)),
            ],
            # One resident (1, HW) accumulator block per 'parallel' partition.
            out_specs=pl.BlockSpec((None, 1, hw), lambda p, i: (p, 0, 0)),
        ),
        compiler_params=pltpu.CompilerParams(
            dimension_semantics=("parallel", "arbitrary"),
            # Leave headroom under v7x's 64 MiB physical VMEM per TC; at real
            # HW=224^2 shapes size `chunk` so 2*chunk*HW*2B of mask double-buffer
            # plus residents stay under this budget.
            vmem_limit_bytes=48 * 1024 * 1024,
        ),
    )(masks_flat, w_eff, b, onehot)

    # Sum per-core partial saliencies and apply the RISE normalization (/ N / p1).
    return partial.sum(axis=0) / (n * p1)


def device_defaults():
    """(parts, chunk) tuned per TPU generation.

    parts : one resident accumulator per TensorCore (2 on v7x megacore, else 1 --
            v5e/v6e have a single TC, so a second partition only adds overhead).
    chunk : mask rows per step -- fill the MXU M dimension (256 on v6e's 2x256
            MXU; 128 on v5e's 128x128 MXU; 128 on v7x so the mask double-buffer
            fits its 64 MiB VMEM at real HW=224^2 shapes).
    """
    kind = ""
    try:
        kind = jax.devices()[0].device_kind.lower()
    except Exception:
        pass
    parts = 2 if "v7" in kind else 1
    chunk = 256 if "v6" in kind else 128
    return parts, chunk


def generate_masks(key, n, s, p1, h, w):
    """Deterministic JAX port of RISE.generate_masks (glue, runs once)."""
    # TODO(synk): skimage.transform.resize(mode='reflect') is approximated with
    # jax.image.resize(bilinear); not bit-exact to the original mask generator.
    cell_h = int(np.ceil(h / s))
    cell_w = int(np.ceil(w / s))
    up_h, up_w = (s + 1) * cell_h, (s + 1) * cell_w
    k1, k2, k3 = jax.random.split(key, 3)
    grid = (jax.random.uniform(k1, (n, s, s)) < p1).astype(jnp.float32)
    xs = jax.random.randint(k2, (n,), 0, cell_h)
    ys = jax.random.randint(k3, (n,), 0, cell_w)
    up = jax.image.resize(grid, (n, up_h, up_w), method="bilinear")
    crop = jax.vmap(lambda u, xi, yi: jax.lax.dynamic_slice(u, (xi, yi), (h, w)))
    return crop(up, xs, ys)  # (N, H, W) float32


if __name__ == "__main__":
    # Small, forward-consistent shapes.
    B, C, H, W = 1, 4, 16, 16
    N_MASKS, S, P1 = 500, 4, 0.5   # deliberately NOT a multiple of parts*chunk (tail path)
    K_CLASSES = 8
    LANE = 128                     # pad K to a full lane width

    PARTS, CHUNK = device_defaults()

    key = jax.random.PRNGKey(0)
    kx, kw, kb, km = jax.random.split(key, 4)

    x = jax.random.normal(kx, (B, C, H, W), dtype=jnp.float32)        # NCHW input
    weight = jax.random.normal(kw, (C, H * W, K_CLASSES), dtype=jnp.float32) * 0.02
    bias = jax.random.normal(kb, (1, K_CLASSES), dtype=jnp.float32) * 0.02
    masks = generate_masks(km, N_MASKS, S, P1, H, W)                  # (N, H, W)

    x_flat = x[0].reshape(C, H * W)                                   # (C, HW)
    # Fold the linear model into the weight: W_eff[hw,k] = sum_c x[c,hw] * W[c,hw,k].
    w_eff_f32 = jnp.einsum("ch,chk->hk", x_flat, weight)              # (HW, K)

    # class_idx = argmax(model(x))  (unmasked image == all-ones mask; glue, plain JAX)
    logits_x = w_eff_f32.sum(axis=0) + bias[0]
    class_idx = int(jnp.argmax(logits_x))

    # Pad K to a lane multiple: zero weight columns, -1e9 bias (padded classes
    # vanish from the softmax), one-hot selector for class_idx.
    K_PAD = int(pl.cdiv(K_CLASSES, LANE)) * LANE
    w_eff_pad = jnp.zeros((H * W, K_PAD), jnp.float32).at[:, :K_CLASSES].set(w_eff_f32)
    bias_pad = jnp.full((1, K_PAD), -1e9, jnp.float32).at[:, :K_CLASSES].set(bias)
    onehot = jnp.zeros((1, K_PAD), jnp.float32).at[0, class_idx].set(1.0)

    # bf16 streaming for masks (halves HBM traffic) and the resident folded weight.
    masks_bf16 = masks.reshape(N_MASKS, H * W).astype(jnp.bfloat16)   # (N, HW)
    w_eff_bf16 = w_eff_pad.astype(jnp.bfloat16)                       # (HW, K_PAD)

    sal = rise_saliency(masks_bf16, w_eff_bf16, bias_pad, onehot,
                        p1=P1, chunk=CHUNK, parts=PARTS)
    sal = jax.block_until_ready(sal).reshape(H, W)

    # Pure-JAX reference of RISE.forward semantics (same bf16-quantized operands,
    # unpadded K).
    m_ref = masks_bf16.astype(jnp.float32)
    we_ref = w_eff_bf16[:, :K_CLASSES].astype(jnp.float32)
    logits_ref = m_ref @ we_ref + bias                                # (N, K)
    probs_ref = jax.nn.softmax(logits_ref, axis=1)[:, class_idx]
    sal_ref = (probs_ref[:, None] * m_ref).sum(axis=0) / N_MASKS / P1
    sal_ref = sal_ref.reshape(H, W)

    np.testing.assert_allclose(np.asarray(sal), np.asarray(sal_ref),
                               rtol=1e-2, atol=2e-3)
    print("KERNEL_OK")
</pallas_src>

<mosaic_0001>
module attributes {stable_mosaic.version = 11 : i64} {
  func.func @rise_kernel(%arg0: i32, %arg1: i32, %arg2: memref<128x256xbf16, #tpu.memory_space<vmem>>, %arg3: memref<256x128xbf16, #tpu.memory_space<vmem>>, %arg4: memref<1x128xf32, #tpu.memory_space<vmem>>, %arg5: memref<1x128xf32, #tpu.memory_space<vmem>>, %arg6: memref<1x1x256xf32, #tpu.memory_space<vmem>>) attributes {dimension_semantics = [#tpu.dimension_semantics<parallel>, #tpu.dimension_semantics<arbitrary>], iteration_bounds = array<i64: 1, 4>, scalar_prefetch = 0 : i64, scratch_operands = 0 : i64, tpu.core_type = #tpu.core_type<tc>, window_params = [{transform_indices = @transform_0, window_bounds = array<i64: 128, 256>}, {pipeline_mode = #tpu.pipeline_mode<synchronous>, transform_indices = @transform_1, window_bounds = array<i64: 256, 128>}, {pipeline_mode = #tpu.pipeline_mode<synchronous>, transform_indices = @transform_2, window_bounds = array<i64: 1, 128>}, {pipeline_mode = #tpu.pipeline_mode<synchronous>, transform_indices = @transform_3, window_bounds = array<i64: 1, 128>}, {transform_indices = @transform_4, window_bounds = array<i64: 1, 1, 256>}]} {
    %c0_i32 = arith.constant 0 : i32
    %0 = arith.cmpi eq, %arg1, %c0_i32 : i32
    %1 = arith.extui %0 : i1 to i32
    %c0_i32_0 = arith.constant 0 : i32
    %2 = arith.cmpi ne, %1, %c0_i32_0 : i32
    scf.if %2 {
      %cst_18 = arith.constant 0.000000e+00 : f32
      %31 = vector.broadcast %cst_18 : f32 to vector<1x256xf32>
      %c0_19 = arith.constant 0 : index
      %c0_20 = arith.constant 0 : index
      %c0_21 = arith.constant 0 : index
      %32 = vector.load %arg6[%c0_19, %c0_20, %c0_21] : memref<1x1x256xf32, #tpu.memory_space<vmem>>, vector<1x1x256xf32>
      %33 = vector.shape_cast %32 : vector<1x1x256xf32> to vector<1x256xf32>
      %34 = vector.shape_cast %31 : vector<1x256xf32> to vector<1x1x256xf32>
      tpu.vector_store %arg6[%c0_19, %c0_20, %c0_21], %34 {strides = array<i32>} : memref<1x1x256xf32, #tpu.memory_space<vmem>>, vector<1x1x256xf32>,
    } else {
    }
    %c0 = arith.constant 0 : index
    %c0_1 = arith.constant 0 : index
    %3 = vector.load %arg2[%c0, %c0_1] : memref<128x256xbf16, #tpu.memory_space<vmem>>, vector<128x256xbf16>
    %c0_2 = arith.constant 0 : index
    %c0_3 = arith.constant 0 : index
    %4 = vector.load %arg3[%c0_2, %c0_3] : memref<256x128xbf16, #tpu.memory_space<vmem>>, vector<256x128xbf16>
    %cst = arith.constant dense<0.000000e+00> : vector<128x128xf32>
    %5 = tpu.matmul %3, %4, %cst {dimension_numbers = #tpu.dot_dimension_numbers<[1], [0], [0], [1], [0, 0, 1, 1], [], []>} : vector<128x256xbf16>, vector<256x128xbf16>, vector<128x128xf32> -> vector<128x128xf32>
    %c0_4 = arith.constant 0 : index
    %c0_5 = arith.constant 0 : index
    %6 = vector.load %arg4[%c0_4, %c0_5] : memref<1x128xf32, #tpu.memory_space<vmem>>, vector<1x128xf32>
    %7 = vector.broadcast %6 : vector<1x128xf32> to vector<128x128xf32>
    %8 = arith.addf %5, %7 : vector<128x128xf32>
    %cst_6 = arith.constant dense<0xFF800000> : vector<128xf32>
    %9 = vector.multi_reduction <maximumf>, %8, %cst_6 [1] : vector<128x128xf32> to vector<128xf32>
    %10 = vector.shape_cast %9 : vector<128xf32> to vector<128x1xf32>
    %11 = vector.broadcast %10 : vector<128x1xf32> to vector<128x128xf32>
    %12 = arith.subf %8, %11 : vector<128x128xf32>
    %13 = math.exp %12 : vector<128x128xf32>
    %cst_7 = arith.constant dense<0.000000e+00> : vector<128xf32>
    %14 = vector.multi_reduction <add>, %13, %cst_7 [1] : vector<128x128xf32> to vector<128xf32>
    %15 = vector.shape_cast %14 : vector<128xf32> to vector<128x1xf32>
    %c0_8 = arith.constant 0 : index
    %c0_9 = arith.constant 0 : index
    %16 = vector.load %arg5[%c0_8, %c0_9] : memref<1x128xf32, #tpu.memory_space<vmem>>, vector<1x128xf32>
    %17 = vector.broadcast %16 : vector<1x128xf32> to vector<128x128xf32>
    %18 = arith.mulf %13, %17 : vector<128x128xf32>
    %cst_10 = arith.constant dense<0.000000e+00> : vector<128xf32>
    %19 = vector.multi_reduction <add>, %18, %cst_10 [1] : vector<128x128xf32> to vector<128xf32>
    %20 = vector.shape_cast %19 : vector<128xf32> to vector<128x1xf32>
    %21 = tpu.reciprocal %15 {approx = true} : vector<128x1xf32> -> vector<128x1xf32>
    %22 = arith.mulf %20, %21 : vector<128x1xf32>
    %c0_11 = arith.constant 0 : index
    %c0_12 = arith.constant 0 : index
    %c0_13 = arith.constant 0 : index
    %23 = vector.load %arg6[%c0_11, %c0_12, %c0_13] : memref<1x1x256xf32, #tpu.memory_space<vmem>>, vector<1x1x256xf32>
    %24 = vector.shape_cast %23 : vector<1x1x256xf32> to vector<1x256xf32>
    %25 = arith.truncf %22 : vector<128x1xf32> to vector<128x1xbf16>
    %cst_14 = arith.constant dense<0.000000e+00> : vector<1x256xf32>
    %26 = tpu.matmul %25, %3, %cst_14 {dimension_numbers = #tpu.dot_dimension_numbers<[0], [0], [1], [1], [0, 1, 1, 1], [], []>} : vector<128x1xbf16>, vector<128x256xbf16>, vector<1x256xf32> -> vector<1x256xf32>
    %27 = arith.addf %24, %26 : vector<1x256xf32>
    %c0_15 = arith.constant 0 : index
    %c0_16 = arith.constant 0 : index
    %c0_17 = arith.constant 0 : index
    %28 = vector.load %arg6[%c0_15, %c0_16, %c0_17] : memref<1x1x256xf32, #tpu.memory_space<vmem>>, vector<1x1x256xf32>
    %29 = vector.shape_cast %28 : vector<1x1x256xf32> to vector<1x256xf32>
    %30 = vector.shape_cast %27 : vector<1x256xf32> to vector<1x1x256xf32>
    tpu.vector_store %arg6[%c0_15, %c0_16, %c0_17], %30 {strides = array<i32>} : memref<1x1x256xf32, #tpu.memory_space<vmem>>, vector<1x1x256xf32>,
    return
  }
  func.func @transform_0(%arg0: i32, %arg1: i32) -> (i32, i32) {
    %c4_i32 = arith.constant 4 : i32
    %0 = arith.muli %arg0, %c4_i32 : i32
    %1 = arith.addi %0, %arg1 : i32
    %c0_i32 = arith.constant 0 : i32
    %c0_i32_0 = arith.constant 0 : i32
    return %1, %c0_i32 : i32, i32
  }
  func.func @transform_1(%arg0: i32, %arg1: i32) -> (i32, i32) {
    %c0_i32 = arith.constant 0 : i32
    %c0_i32_0 = arith.constant 0 : i32
    %c0_i32_1 = arith.constant 0 : i32
    return %c0_i32, %c0_i32_0 : i32, i32
  }
  func.func @transform_2(%arg0: i32, %arg1: i32) -> (i32, i32) {
    %c0_i32 = arith.constant 0 : i32
    %c0_i32_0 = arith.constant 0 : i32
    %c0_i32_1 = arith.constant 0 : i32
    return %c0_i32, %c0_i32_0 : i32, i32
  }
  func.func @transform_3(%arg0: i32, %arg1: i32) -> (i32, i32) {
    %c0_i32 = arith.constant 0 : i32
    %c0_i32_0 = arith.constant 0 : i32
    %c0_i32_1 = arith.constant 0 : i32
    return %c0_i32, %c0_i32_0 : i32, i32
  }
  func.func @transform_4(%arg0: i32, %arg1: i32) -> (i32, i32, i32) {
    %c0_i32 = arith.constant 0 : i32
    %c0_i32_0 = arith.constant 0 : i32
    %c0_i32_1 = arith.constant 0 : i32
    return %arg0, %c0_i32, %c0_i32_0 : i32, i32, i32
  }
}

</mosaic_0001>

<bundles_post_ra>
// kernel: tpu_custom_call.1
= control target key start
LH: loop header
LB: loop body
LE: loop exit
PB: predicated region body
PF: predicated region fallthrough
CT: control target
= control target key end

     0   :  { %9 = vsyncpa [#allocation3], 0  ;;  %s1743_s0 = inlined_call_operand.hbm [shape: bf16[512,256], index: 0, kind: input, shape index: {}]   ;;  %s1744_s1 = inlined_call_operand.hbm [shape: bf16[256,128], index: 1, kind: input, shape index: {}]   ;;  %s1745_s2 = inlined_call_operand.vmem [shape: f32[1,128], index: 2, kind: input, shape index: {}]   ;;  %s1746_s3 = inlined_call_operand.vmem [shape: f32[1,128], index: 3, kind: input, shape index: {}]   ;;  %s1747_s4 = inlined_call_operand.hbm [shape: f32[1,1,256], index: 4, kind: output, shape index: {}]  }
   0x1   :  { %11 = vsyncpa [#allocation3 + $0x1], 0 }
   0x2   :  { %12 = vsyncpa [#allocation6], 0 }
   0x3   :  { %13 = vsyncpa [#allocation4], 0  ;;  %s1435_s15 = smov 0   ;;  %s1437_s16 = smov 0  }
   0x4   :  { %s1439_s17 = smov 0   ;;  %s1441_s18 = smov 0  }
   0x5   :  { %s1443_s19 = smov 0   ;;  %s1445_s20 = smov 0  }
   0x6 LB: > { %s956_s21 = sadd.s32 4294967295, %s1398_s20   ;;  %p55_p0 = scmp.ne.s32.totalorder %s1382_s16, %s1378_s15  ;;  %s1398_s20 = sphi %s1445_s20, %s19_s20   ;;  %s1394_s19 = sphi %s1443_s19, %s1765_s19   ;;  %s1390_s18 = sphi %s1441_s18, %s1764_s18   ;;  %s1386_s17 = sphi %s1439_s17, %s1763_s17   ;;  %s1382_s16 = sphi %s1437_s16, %s1762_s16   ;;  %s1378_s15 = sphi %s1435_s15, %s1761_s15  }
   0x7   : > { %p1467_p1 = scmp.eq.s32.totalorder %s956_s21, 0  ;;  %p957_p2 = scmp.ge.s32.totalorder %s1398_s20, 1 }
   0x8   : > { %p155_p3 = scmp.lt.s32.totalorder %s1398_s20, 5  ;;  %s1400_s25 = smov [#allocation5]  }
   0x9   : > { %s1752_s22 = scalar_select %p1467_p1, 1, 0 }
   0xa   : > { %p1475_p4 = por %p1467_p1, %p55_p0  ;;  %p1479_p5 = pnand %p957_p2, %p155_p3 }
   0xb   : > { %s167_s26 = sshll.u32 %s1400_s25, 4  ;;  %s28_s28 = sadd.s32 1, %s1394_s19  ;;  %s168_s26 = int_to_ptr.vmem [resolvable:$true] %s167_s26 }
   0xc   : > { %s1753_s23 = scalar_select %p1475_p4, 1, 0 }
   0xd   : > { %s1754_s24 = scalar_select %p1479_p5, 1, 0 }
   0xe   : > { %p1082_p6 = pneg %p1479_p5  ;;  %s1256_s5 = scalar_lea.hbm %s1744_s1, 2048 }
   0xf   : > { %p1257_p8 = scmp.ne.s32.totalorder %s1744_s1, %s1256_s5  ;;  %p1263_p12 = scmp.lt.u32.totalorder %s1256_s5, %s1744_s1 }
  0x10   : > { %p1487_p7 = pnand %p1082_p6, %p1467_p1 }
  0x12   : > { %p1258_p9 = pneg %p1487_p7 }
  0x14   : > { %p1259_p10 = pnand %p1258_p9, %p1257_p8 }
  0x16   : > { %p1260_p11 = pneg %p1259_p10 }
  0x18   : > { %p1265_p13 = pnand %p1263_p12, %p1260_p11 }
  0x1a   : > { %1268 = shalt.err (!%p1265_p13)
}
  0x1b   : > { %s1269_s10 = scalar_lea.vmem %s168_s26, 2048  ;;  %p1277_p6 = scmp.lt.s32.totalorder %s168_s26, %s168_s26 }
  0x1c   : > { %p1270_p0 = scmp.ne.s32.totalorder %s168_s26, %s1269_s10  ;;  %p1278_p1 = scmp.lt.s32.totalorder %s1269_s10, %s1269_s10 }
  0x1e   : > { %p1272_p2 = pnand %p1270_p0, %p1258_p9  ;;  %p1279_p4 = por %p1278_p1, %p1277_p6 }
  0x20   : > { %p1273_p3 = pneg %p1272_p2 }
  0x22   : > { %p1280_p5 = pnand %p1279_p4, %p1273_p3 }
  0x24   : > { %1283 = shalt.err (!%p1280_p5)
}
  0x25   : > { %s1401_s11 = smov 64   ;;  %s1402_s12 = smov 4  }
  0x26   : > { %1085 = dma.hbm_to_vmem [thread:$0]  (!%p1487_p7), %s1744_s1, 2048, %s168_s26, [#allocation6], %s1401_s11, %s1401_s11, %s1402_s12  }
  0x27   : > { %p29_p1 = scmp.ge.s32.totalorder %s28_s28, 4  ;;  %s42_s15 = sadd.s32 1, %s1386_s17 }
  0x28   : > { %p49_p4 = scmp.ne.s32.totalorder %s1386_s17, %s1382_s16  ;;  %p50_p5 = scmp.eq.s32.totalorder %s1398_s20, 0 }
  0x29   : > { %s1767_s28 = smov (%p29_p1, %s28_s28), 0  ;;  %p1091_p9 = scmp.lt.s32.totalorder %s1398_s20, 4 }
  0x2a   : > { %p51_p8 = por %p50_p5, %p49_p4  ;;  %s39_s25 = ssub.s32 %s1394_s19, %s1767_s28 }
  0x2b   : > { %s187_s29 = sand.u32 1, %s1386_s17   ;;  %p40_p10 = scmp.eq.s32.totalorder %s39_s25, 0 }
  0x2c   : > { %s960_s30 = sshll.u32 %s187_s29, 7  ;;  %s1007_s5 = sshll.u32 %s1394_s19, 11 }
  0x2d   : > { %s1520_s6 = scalar_select %p40_p10, %s1386_s17, %s42_s15  }
  0x2e   : > { %s1525_s26 = scalar_lea.hbm %s1743_s0, %s1007_s5  ;;  %s191_s8 = scalar_lea.vmem [#allocation2], %s960_s30 }
  0x2f   : > { %s201_s9 = sshll.u32 %s191_s8, 4  ;;  %p1527_p7 = pnand %p1091_p9, %p51_p8  ;;  %s1531_s9 = int_to_ptr.vmem [resolvable:$true] %s201_s9 }
  0x30   : > { %s1533_s11 = scalar_lea.sflag [#allocation3], %s187_s29  ;;  %s1284_s12 = scalar_lea.hbm %s1525_s26, 2048 }
  0x31   : > { %p1285_p11 = scmp.ne.s32.totalorder %s1525_s26, %s1284_s12  ;;  %p1286_p12 = pneg %p1527_p7 }
  0x32   : > { %s1289_s15 = scalar_lea.hbm %s1743_s0, 8192  ;;  %p1290_p2 = scmp.lt.u32.totalorder %s1525_s26, %s1743_s0 }
  0x33   : > { %p1287_p13 = pnand %p1286_p12, %p1285_p11  ;;  %p1291_p3 = scmp.lt.u32.totalorder %s1289_s15, %s1284_s12 }
  0x34   : > { %p1293_p1 = scmp.lt.u32.totalorder %s1284_s12, %s1525_s26 }
  0x35   : > { %p1288_p0 = pneg %p1287_p13  ;;  %p1292_p6 = por %p1291_p3, %p1290_p2 }
  0x37   : > { %p1294_p4 = por %p1293_p1, %p1292_p6 }
  0x39   : > { %p1295_p5 = pnand %p1294_p4, %p1288_p0 }
  0x3b   : > { %1298 = shalt.err (!%p1295_p5)
}
  0x3c   : > { %s1299_s29 = scalar_lea.vmem %s1531_s9, 2048  ;;  %s1403_s5 = smov [#allocation2]  }
  0x3d   : > { %p1300_p8 = scmp.ne.s32.totalorder %s1531_s9, %s1299_s29  ;;  %s1304_s27 = sshll.u32 %s1403_s5, 4  ;;  %s1305_s27 = int_to_ptr.vmem [resolvable:$false] %s1304_s27 }
  0x3e   : > { %s1306_s7 = scalar_lea.vmem %s1305_s27, 4096  ;;  %p1307_p11 = scmp.lt.s32.totalorder %s1531_s9, %s1305_s27 }
  0x3f   : > { %p1302_p9 = pnand %p1300_p8, %p1286_p12  ;;  %p1308_p13 = scmp.lt.s32.totalorder %s1306_s7, %s1299_s29 }
  0x41   : > { %p1303_p10 = pneg %p1302_p9  ;;  %p1309_p2 = por %p1308_p13, %p1307_p11 }
  0x43   : > { %p1310_p3 = pnand %p1309_p2, %p1303_p10 }
  0x45   : > { %1313 = shalt.err (!%p1310_p3)
}
  0x46   : > { %s1404_s8 = smov 128   ;;  %s1405_s12 = smov 8  }
  0x47   : > { %1089 = dma.hbm_to_vmem [thread:$0]  (!%p1527_p7), %s1525_s26, 2048, %s1531_s9, %s1533_s11, %s1404_s8, %s1404_s8, %s1405_s12  }
  0x48   : > { %p1757_p12 = scmp.ne.s32.totalorder %s1754_s24, 0 }
  0x49   : > { %s215_s13 = sand.u32 (!%p1757_p12), 1, %s1382_s16   ;;  %p1758_p0 = scmp.ne.s32.totalorder (!%p1757_p12), %s1753_s23, 0 }
  0x4a   : > { %213 = sbr.rel (%p1757_p12) target bundleno = 1028 (0x404), region = 36  ;;  %s965_s14 = sshll.u32 (!%p1757_p12), %s215_s13, 7 }
  0x4b   : > { %s216_s15 = scalar_lea.sflag (!%p1757_p12), [#allocation3], %s215_s13  ;;  %s1564_s25 = scalar_lea.vmem (!%p1757_p12), [#allocation2], %s965_s14 }
  0x51   : > { %1365 = dma.done.wait (%p1758_p0), %s216_s15, 2048  }
  0x52   : > { %1367 = vsyncadd (%p1758_p0), %s216_s15, 4294965248  ;;  %p1759_p6 = scmp.ne.s32.totalorder %s1752_s22, 0 }
  0x54   : > { %1369 = dma.done.wait (%p1759_p6), [#allocation6], 2048  }
  0x55   : > { %1371 = vsyncadd (%p1759_p6), [#allocation6], 4294965248  ;;  %p967_p7 = scmp.ne.s32.totalorder %s1390_s18, 0 }
  0x56   : > { %v251_v0 = vlaneseq (!%p967_p7)  ;;  %v1406_v1 = vmov (!%p967_p7), 0.0  }
  0x57   : > { %250 = sbr.rel (%p967_p7) target bundleno = 94 (0x5e), region = 48 }
  0x58   : > { %vm253_vm0 = vcmp.lt.s32.totalorder (!%p967_p7), %v251_v0, 256 }
  0x59   : > { %255 = vst.msk [vmem:[#allocation7] sm:$0x3] (!%p967_p7), %vm253_vm0, %v1406_v1 }
  0x5e PF: > { %v1152_v2 = vld [vmem:[#allocation5 + $0x40] sm:$0xff]   ;;  %v1154_v4 = vld [vmem:[#allocation5 + $0x48] sm:$0xff]   ;;  %v1156_v6 = vld [vmem:[#allocation5 + $0x50] sm:$0xff]   ;;  %s1409_s26 = smov [#allocation7]   ;;  %p1699_p1 = scmp.eq.s32.totalorder %s956_s21, 3 }
  0x5f   : > { %v1153_v3 = vld [vmem:[#allocation5] sm:$0xff]   ;;  %1008 = vmatprep.subr.bf16.mxu0 %v1152_v2  ;;  %v1155_v5 = vld [vmem:[#allocation5 + $0x8] sm:$0xff]   ;;  %v1157_v7 = vld [vmem:[#allocation5 + $0x10] sm:$0xff]   ;;  %s883_s9 = sshll.u32 %s1409_s26, 4  ;;  %s884_s9 = int_to_ptr.vmem [resolvable:$true] %s883_s9 }
  0x60   : > { %1009 = vmatpush3.bf16.msra.mxu0 %v1153_v3  ;;  %v1158_v8 = vld [vmem:[#allocation5 + $0x58] sm:$0xff]   ;;  %v1160_v10 = vld [vmem:[#allocation5 + $0x60] sm:$0xff]   ;;  %v1162_v12 = vld [vmem:[#allocation5 + $0x68] sm:$0xff]   ;;  %s1314_s11 = scalar_lea.vmem %s884_s9, 32  ;;  %p1321_p9 = scmp.lt.s32.totalorder %s884_s9, %s884_s9 }
  0x61   : > { %1010 = vmatprep.subr.bf16.mxu0 %v1154_v4  ;;  %v1159_v9 = vld [vmem:[#allocation5 + $0x18] sm:$0xff]   ;;  %v1161_v11 = vld [vmem:[#allocation5 + $0x20] sm:$0xff]   ;;  %v1163_v14 = vld [vmem:[#allocation5 + $0x28] sm:$0xff]   ;;  %p1315_p4 = scmp.ne.s32.totalorder %s884_s9, %s1314_s11  ;;  %p1322_p10 = scmp.lt.s32.totalorder %s1314_s11, %s1314_s11 }
  0x62   : > { %v1170_v13 = vld [vmem:[%s1564_s25 + $0x4] ss:$8 sps:$4 sm:$0xff]   ;;  %v1164_v15 = vld [vmem:[#allocation5 + $0x70] sm:$0xff]   ;;  %v1168_v16 = vld [vmem:[%s1564_s25] ss:$8 sps:$4 sm:$0xff]  }
  0x63   : > { %519 = vmatprep.mubr.bf16.mxu0 %v1170_v13  ;;  %v1171_v17 = vld [vmem:[%s1564_s25 + $0x14] ss:$8 sps:$4 sm:$0xff]   ;;  %808 = vmatprep.subr.bf16.mxu1 %v1170_v13  ;;  %v1173_v20 = vld [vmem:[%s1564_s25 + $0x10] ss:$8 sps:$4 sm:$0xff]   ;;  %v1174_v21 = vld [vmem:[%s1564_s25 + $0x24] ss:$8 sps:$4 sm:$0xff]   ;;  %p1316_p5 = pnand %p1315_p4, %p1699_p1  ;;  %p1323_p11 = por %p1322_p10, %p1321_p9 }
  0x64   : > { %1011 = vmatpush3.bf16.msra.mxu0 %v1155_v5  ;;  %809 = vmatpush1.bf16.msra.mxu1 %v1168_v16  ;;  %v1165_v18 = vld [vmem:[#allocation5 + $0x30] sm:$0xff]   ;;  %v1166_v19 = vld [vmem:[#allocation5 + $0x78] sm:$0xff]   ;;  %v1176_v23 = vld [vmem:[%s1564_s25 + $0x20] ss:$8 sps:$4 sm:$0xff]  }
  0x65   : > { %1012 = vmatprep.subr.bf16.mxu0 %v1156_v6  ;;  %810 = vmatprep.subr.bf16.mxu1 %v1171_v17  ;;  %v1167_v22 = vld [vmem:[#allocation5 + $0x38] sm:$0xff]   ;;  %v1180_v26 = vld [vmem:[%s1564_s25 + $0x44] ss:$8 sps:$4 sm:$0xff]   ;;  %v1182_v27 = vld [vmem:[%s1564_s25 + $0x40] ss:$8 sps:$4 sm:$0xff]   ;;  %p1317_p8 = pneg %p1316_p5 }
  0x66   : > { %v1177_v24 = vld [vmem:[%s1564_s25 + $0x34] ss:$8 sps:$4 sm:$0xff]   ;;  %v1179_v25 = vld [vmem:[%s1564_s25 + $0x30] ss:$8 sps:$4 sm:$0xff]   ;;  %v1186_v30 = vld [vmem:[%s1564_s25 + $0x64] ss:$8 sps:$4 sm:$0xff]  }
  0x67   : > { %v1183_v28 = vld [vmem:[%s1564_s25 + $0x54] ss:$8 sps:$4 sm:$0xff]   ;;  %v1185_v29 = vld [vmem:[%s1564_s25 + $0x50] ss:$8 sps:$4 sm:$0xff]   ;;  %v1188_v31 = vld [vmem:[%s1564_s25 + $0x60] ss:$8 sps:$4 sm:$0xff]   ;;  %p1324_p13 = pnand %p1323_p11, %p1317_p8 }
  0x68   : > { %1013 = vmatpush3.bf16.msra.mxu0 %v1157_v7  ;;  %811 = vmatpush1.bf16.msra.mxu1 %v1173_v20  ;;  %v1189_v32 = vld [vmem:[%s1564_s25 + $0x74] ss:$8 sps:$4 sm:$0xff]   ;;  %v1191_v33 = vld [vmem:[%s1564_s25 + $0x70] ss:$8 sps:$4 sm:$0xff]   ;;  %v1594_v36 = vld [vmem:[%s1745_s2] ss:$0 sm:$0xff] }
  0x69   : > { %1014 = vmatprep.subr.bf16.mxu0 %v1158_v8  ;;  %812 = vmatprep.subr.bf16.mxu1 %v1174_v21 }
  0x6c   : > { %1015 = vmatpush3.bf16.msra.mxu0 %v1159_v9  ;;  %813 = vmatpush1.bf16.msra.mxu1 %v1176_v23 }
  0x6d   : > { %1016 = vmatprep.subr.bf16.mxu0 %v1160_v10  ;;  %814 = vmatprep.subr.bf16.mxu1 %v1177_v24 }
  0x70   : > { %1017 = vmatpush3.bf16.msra.mxu0 %v1161_v11  ;;  %815 = vmatpush1.bf16.msra.mxu1 %v1179_v25 }
  0x71   : > { %1018 = vmatprep.subr.bf16.mxu0 %v1162_v12  ;;  %816 = vmatprep.subr.bf16.mxu1 %v1180_v26 }
  0x74   : > { %1019 = vmatpush3.bf16.msra.mxu0 %v1163_v14  ;;  %817 = vmatpush1.bf16.msra.mxu1 %v1182_v27 }
  0x75   : > { %1020 = vmatprep.subr.bf16.mxu0 %v1164_v15  ;;  %818 = vmatprep.subr.bf16.mxu1 %v1183_v28 }
  0x78   : > { %1021 = vmatpush3.bf16.msra.mxu0 %v1165_v18  ;;  %819 = vmatpush1.bf16.msra.mxu1 %v1185_v29 }
  0x79   : > { %1022 = vmatprep.subr.bf16.mxu0 %v1166_v19  ;;  %820 = vmatprep.subr.bf16.mxu1 %v1186_v30 }
  0x7c   : > { %1023 = vmatpush3.bf16.msra.mxu0 %v1167_v22  ;;  %821 = vmatpush1.bf16.msra.mxu1 %v1188_v31 }
  0x7d   : > { %822 = vmatprep.subr.bf16.mxu1 %v1189_v32 }
  0x7f   : > { %520 = vmatmul.mubr.bf16.vlgmr.msra.gmra.mrb[0].mxu0 %v1168_v16 }
  0x80   : > { %527 = vmatprep.mubr.bf16.mxu0 %v1171_v17  ;;  %823 = vmatpush1.bf16.msra.mxu1 %v1191_v33 }
  0x87   : > { %528 = vmatmul.mubr.bf16.gmra.mrb[4].mxu0 %v1173_v20 }
  0x88   : > { %535 = vmatprep.mubr.bf16.mxu0 %v1174_v21 }
  0x8f   : > { %536 = vmatmul.mubr.bf16.gmra.mrb[8].mxu0 %v1176_v23 }
  0x90   : > { %543 = vmatprep.mubr.bf16.mxu0 %v1177_v24 }
  0x97   : > { %544 = vmatmul.mubr.bf16.gmra.mrb[12].mxu0 %v1179_v25 }
  0x98   : > { %551 = vmatprep.mubr.bf16.mxu0 %v1180_v26 }
  0x9f   : > { %552 = vmatmul.mubr.bf16.gmra.mrb[16].mxu0 %v1182_v27 }
  0xa0   : > { %559 = vmatprep.mubr.bf16.mxu0 %v1183_v28 }
  0xa7   : > { %560 = vmatmul.mubr.bf16.gmra.mrb[20].mxu0 %v1185_v29 }
  0xa8   : > { %567 = vmatprep.mubr.bf16.mxu0 %v1186_v30 }
  0xaf   : > { %568 = vmatmul.mubr.bf16.gmra.mrb[24].mxu0 %v1188_v31 }
  0xb0   : > { %575 = vmatprep.mubr.bf16.mxu0 %v1189_v32 }
  0xb7   : > { %576 = vmatmul.mubr.bf16.gmra.mrb[28].mxu0 %v1191_v33 }
 0x152   : > { %v1024_v34 = vpop.f32.mrb[0].mxu0 }
 0x153   : > { %v1025_v35 = vpop.f32.mrb[1].mxu0 }
 0x154   : > { %v1026_v37 = vadd.f32 %v1025_v35, %v1024_v34  ;;  %v1027_v38 = vpop.f32.mrb[2].mxu0 }
 0x155   : > { %v1028_v39 = vpop.f32.mrb[3].mxu0 }
 0x156   : > { %v1029_v40 = vadd.f32 %v1028_v39, %v1027_v38  ;;  %v1597_v41 = vadd.f32 %v1026_v37, %v1594_v36 }
 0x158   : > { %584 = vmax.xlane.f32.xlu0 %v1597_v41  ;;  %v1601_v43 = vadd.f32 %v1029_v40, %v1594_v36 }
 0x15a   : > { %v1030_v42 = vpop.f32.mrb[4].mxu0 }
 0x15b   : > { %v1031_v44 = vpop.f32.mrb[5].mxu0 }
 0x15c   : > { %v1032_v45 = vadd.f32 %v1031_v44, %v1030_v42  ;;  %v1033_v46 = vpop.f32.mrb[6].mxu0  ;;  %586 = vmax.xlane.f32.xlu0 %v1601_v43 }
 0x15d   : > { %v1034_v47 = vpop.f32.mrb[7].mxu0 }
 0x15e   : > { %v1035_v48 = vadd.f32 %v1034_v47, %v1033_v46  ;;  %v1605_v49 = vadd.f32 %v1032_v45, %v1594_v36 }
 0x160   : > { %588 = vmax.xlane.f32.xlu1 %v1605_v49  ;;  %v1609_v51 = vadd.f32 %v1035_v48, %v1594_v36 }
 0x162   : > { %v1036_v50 = vpop.f32.mrb[8].mxu0 }
 0x163   : > { %v1037_v52 = vpop.f32.mrb[9].mxu0 }
 0x164   : > { %v1038_v53 = vadd.f32 %v1037_v52, %v1036_v50  ;;  %v1039_v54 = vpop.f32.mrb[10].mxu0  ;;  %590 = vmax.xlane.f32.xlu1 %v1609_v51 }
 0x165   : > { %v1040_v55 = vpop.f32.mrb[11].mxu0 }
 0x166   : > { %v1041_v56 = vadd.f32 %v1040_v55, %v1039_v54  ;;  %v1613_v57 = vadd.f32 %v1038_v53, %v1594_v36 }
 0x168   : > { %592 = vmax.xlane.f32.xlu0 %v1613_v57  ;;  %v1617_v58 = vadd.f32 %v1041_v56, %v1594_v36 }
 0x16a   : > { %v1042_v59 = vpop.f32.mrb[12].mxu0  ;;  %594 = vmax.xlane.f32.xlu1 %v1617_v58 }
 0x16b   : > { %v1043_v60 = vpop.f32.mrb[13].mxu0 }
 0x16c   : > { %v1044_v61 = vadd.f32 %v1043_v60, %v1042_v59  ;;  %v1045_v62 = vpop.f32.mrb[14].mxu0 }
 0x16d   : > { %v1046_v63 = vpop.f32.mrb[15].mxu0 }
 0x16e   : > { %v1047_v0 = vadd.f32 %v1046_v63, %v1045_v62  ;;  %v1621_v1 = vadd.f32 %v1044_v61, %v1594_v36 }
 0x170   : > { %596 = vmax.xlane.f32.xlu0 %v1621_v1  ;;  %v1625_v2 = vadd.f32 %v1047_v0, %v1594_v36 }
 0x172   : > { %v1048_v3 = vpop.f32.mrb[16].mxu0  ;;  %598 = vmax.xlane.f32.xlu1 %v1625_v2 }
 0x173   : > { %v1049_v4 = vpop.f32.mrb[17].mxu0 }
 0x174   : > { %v1050_v5 = vadd.f32 %v1049_v4, %v1048_v3  ;;  %v1051_v6 = vpop.f32.mrb[18].mxu0 }
 0x175   : > { %v1052_v7 = vpop.f32.mrb[19].mxu0 }
 0x176   : > { %v1053_v8 = vadd.f32 %v1052_v7, %v1051_v6  ;;  %v1629_v9 = vadd.f32 %v1050_v5, %v1594_v36 }
 0x178   : > { %600 = vmax.xlane.f32.xlu0 %v1629_v9  ;;  %v1633_v10 = vadd.f32 %v1053_v8, %v1594_v36 }
 0x17a   : > { %v1054_v11 = vpop.f32.mrb[20].mxu0  ;;  %602 = vmax.xlane.f32.xlu1 %v1633_v10 }
 0x17b   : > { %v1055_v12 = vpop.f32.mrb[21].mxu0 }
 0x17c   : > { %v1056_v13 = vadd.f32 %v1055_v12, %v1054_v11  ;;  %v1057_v14 = vpop.f32.mrb[22].mxu0 }
 0x17d   : > { %v1058_v15 = vpop.f32.mrb[23].mxu0 }
 0x17e   : > { %v1059_v16 = vadd.f32 %v1058_v15, %v1057_v14  ;;  %v1637_v17 = vadd.f32 %v1056_v13, %v1594_v36 }
 0x180   : > { %604 = vmax.xlane.f32.xlu0 %v1637_v17  ;;  %v1641_v18 = vadd.f32 %v1059_v16, %v1594_v36 }
 0x182   : > { %v1060_v19 = vpop.f32.mrb[24].mxu0  ;;  %606 = vmax.xlane.f32.xlu1 %v1641_v18 }
 0x183   : > { %v1061_v20 = vpop.f32.mrb[25].mxu0 }
 0x184   : > { %v1062_v21 = vadd.f32 %v1061_v20, %v1060_v19  ;;  %v1063_v22 = vpop.f32.mrb[26].mxu0 }
 0x185   : > { %v1064_v23 = vpop.f32.mrb[27].mxu0 }
 0x186   : > { %v1065_v24 = vadd.f32 %v1064_v23, %v1063_v22  ;;  %v1645_v25 = vadd.f32 %v1062_v21, %v1594_v36 }
 0x188   : > { %608 = vmax.xlane.f32.xlu0 %v1645_v25  ;;  %v1649_v26 = vadd.f32 %v1065_v24, %v1594_v36 }
 0x18a   : > { %v1066_v27 = vpop.f32.mrb[28].mxu0  ;;  %610 = vmax.xlane.f32.xlu1 %v1649_v26 }
 0x18b   : > { %v1067_v28 = vpop.f32.mrb[29].mxu0 }
 0x18c   : > { %v1068_v29 = vadd.f32 %v1067_v28, %v1066_v27  ;;  %v1069_v30 = vpop.f32.mrb[30].mxu0 }
 0x18d   : > { %v1070_v31 = vpop.f32.mrb[31].mxu0 }
 0x18e   : > { %v1071_v32 = vadd.f32 %v1070_v31, %v1069_v30  ;;  %v1653_v33 = vadd.f32 %v1068_v29, %v1594_v36 }
 0x190   : > { %612 = vmax.xlane.f32.xlu0 %v1653_v33  ;;  %v1657_v34 = vadd.f32 %v1071_v32, %v1594_v36 }
 0x192   : > { %614 = vmax.xlane.f32.xlu1 %v1657_v34 }
 0x1e5   : > { %v585_v35 = vpop.xlane.xlu0 %584 }
 0x1e6   : > { %v616_v37 = vsub.f32 %v1597_v41, %v585_v35  ;;  %v1667_v41 = vld [vmem:[%s1746_s3] ss:$0 sm:$0xff] }
 0x1e8   : > { %v632_v38 = vmul.f32 1.442695, %v616_v37 }
 0x1e9   : > { %v587_v39 = vpop.xlane.xlu0 %586 }
 0x1ea   : > { %1192 = vpow2.f32 %v632_v38  ;;  %v617_v40 = vsub.f32 %v1601_v43, %v587_v39 }
 0x1ec   : > { %v634_v42 = vmul.f32 1.442695, %v617_v40 }
 0x1ed   : > { %v589_v44 = vpop.xlane.xlu1 %588 }
 0x1ee   : > { %1194 = vpow2.f32 %v634_v42  ;;  %v618_v45 = vsub.f32 %v1605_v49, %v589_v44 }
 0x1f0   : > { %v636_v46 = vmul.f32 1.442695, %v618_v45 }
 0x1f1   : > { %v591_v47 = vpop.xlane.xlu1 %590 }
 0x1f2   : > { %1196 = vpow2.f32 %v636_v46  ;;  %v619_v36 = vsub.f32 %v1609_v51, %v591_v47 }
 0x1f4   : > { %v1193_v48 = vpop.eup %1192  ;;  %v638_v50 = vmul.f32 1.442695, %v619_v36 }
 0x1f5   : > { %664 = vadd.xlane.f32.xlu0 %v1193_v48  ;;  %v593_v52 = vpop.xlane.xlu0 %592  ;;  %v703_v49 = vmul.f32 %v1193_v48, %v1667_v41 }
 0x1f6   : > { %1198 = vpow2.f32 %v638_v50  ;;  %v620_v43 = vsub.f32 %v1613_v57, %v593_v52 }
 0x1f7   : > { %v595_v53 = vpop.xlane.xlu1 %594 }
 0x1f8   : > { %v1195_v54 = vpop.eup %1194  ;;  %v640_v55 = vmul.f32 1.442695, %v620_v43  ;;  %v621_v56 = vsub.f32 %v1617_v58, %v595_v53 }
 0x1f9   : > { %719 = vadd.xlane.f32.xlu0 %v703_v49  ;;  %666 = vadd.xlane.f32.xlu1 %v1195_v54  ;;  %v704_v59 = vmul.f32 %v1195_v54, %v1667_v41  ;;  %v1407_v54 = vmov 0  }
 0x1fa   : > { %1200 = vpow2.f32 %v640_v55  ;;  %v642_v51 = vmul.f32 1.442695, %v621_v56  ;;  %840 = vmatprep.mubr.bf16.mxu1 %v1407_v54 }
 0x1fc   : > { %v1197_v60 = vpop.eup %1196  ;;  %1202 = vpow2.f32 %v642_v51 }
 0x1fd   : > { %668 = vadd.xlane.f32.xlu0 %v1197_v60  ;;  %721 = vadd.xlane.f32.xlu1 %v704_v59  ;;  %v597_v61 = vpop.xlane.xlu0 %596  ;;  %v705_v63 = vmul.f32 %v1197_v60, %v1667_v41 }
 0x1fe   : > { %v622_v57 = vsub.f32 %v1621_v1, %v597_v61 }
 0x1ff   : > { %v599_v62 = vpop.xlane.xlu1 %598 }
 0x200   : > { %v1199_v0 = vpop.eup %1198  ;;  %v644_v3 = vmul.f32 1.442695, %v622_v57  ;;  %v623_v58 = vsub.f32 %v1625_v2, %v599_v62 }
 0x201   : > { %723 = vadd.xlane.f32.xlu0 %v705_v63  ;;  %670 = vadd.xlane.f32.xlu1 %v1199_v0  ;;  %v706_v5 = vmul.f32 %v1199_v0, %v1667_v41 }
 0x202   : > { %1204 = vpow2.f32 %v644_v3  ;;  %v646_v4 = vmul.f32 1.442695, %v623_v58 }
 0x204   : > { %v1201_v6 = vpop.eup %1200  ;;  %1206 = vpow2.f32 %v646_v4 }
 0x205   : > { %725 = vadd.xlane.f32.xlu1 %v706_v5  ;;  %672 = vadd.xlane.f32.xlu0 %v1201_v6  ;;  %v601_v7 = vpop.xlane.xlu0 %600  ;;  %v707_v11 = vmul.f32 %v1201_v6, %v1667_v41 }
 0x206   : > { %v624_v1 = vsub.f32 %v1629_v9, %v601_v7  ;;  %v1203_v12 = vpop.eup %1202 }
 0x207   : > { %v603_v8 = vpop.xlane.xlu1 %602  ;;  %v708_v15 = vmul.f32 %v1203_v12, %v1667_v41 }
 0x208   : > { %v648_v13 = vmul.f32 1.442695, %v624_v1  ;;  %v625_v2 = vsub.f32 %v1633_v10, %v603_v8 }
 0x209   : > { %674 = vadd.xlane.f32.xlu1 %v1203_v12  ;;  %727 = vadd.xlane.f32.xlu0 %v707_v11 }
 0x20a   : > { %1208 = vpow2.f32 %v648_v13  ;;  %v650_v14 = vmul.f32 1.442695, %v625_v2 }
 0x20c   : > { %v1205_v16 = vpop.eup %1204  ;;  %1210 = vpow2.f32 %v650_v14 }
 0x20d   : > { %729 = vadd.xlane.f32.xlu1 %v708_v15  ;;  %676 = vadd.xlane.f32.xlu0 %v1205_v16  ;;  %v605_v19 = vpop.xlane.xlu0 %604  ;;  %v709_v21 = vmul.f32 %v1205_v16, %v1667_v41 }
 0x20e   : > { %v626_v9 = vsub.f32 %v1637_v17, %v605_v19  ;;  %v1207_v22 = vpop.eup %1206 }
 0x20f   : > { %v607_v20 = vpop.xlane.xlu1 %606  ;;  %v710_v27 = vmul.f32 %v1207_v22, %v1667_v41 }
 0x210   : > { %v652_v23 = vmul.f32 1.442695, %v626_v9  ;;  %v627_v10 = vsub.f32 %v1641_v18, %v607_v20 }
 0x211   : > { %678 = vadd.xlane.f32.xlu1 %v1207_v22  ;;  %731 = vadd.xlane.f32.xlu0 %v709_v21 }
 0x212   : > { %1212 = vpow2.f32 %v652_v23  ;;  %v654_v24 = vmul.f32 1.442695, %v627_v10 }
 0x214   : > { %v1209_v28 = vpop.eup %1208  ;;  %1214 = vpow2.f32 %v654_v24 }
 0x215   : > { %733 = vadd.xlane.f32.xlu1 %v710_v27  ;;  %680 = vadd.xlane.f32.xlu0 %v1209_v28  ;;  %v609_v29 = vpop.xlane.xlu0 %608  ;;  %v711_v31 = vmul.f32 %v1209_v28, %v1667_v41 }
 0x216   : > { %v628_v17 = vsub.f32 %v1645_v25, %v609_v29  ;;  %v1211_v32 = vpop.eup %1210 }
 0x217   : > { %v611_v30 = vpop.xlane.xlu1 %610  ;;  %v712_v38 = vmul.f32 %v1211_v32, %v1667_v41 }
 0x218   : > { %v656_v35 = vmul.f32 1.442695, %v628_v17  ;;  %v629_v18 = vsub.f32 %v1649_v26, %v611_v30 }
 0x219   : > { %682 = vadd.xlane.f32.xlu1 %v1211_v32  ;;  %735 = vadd.xlane.f32.xlu0 %v711_v31 }
 0x21a   : > { %1216 = vpow2.f32 %v656_v35  ;;  %v658_v37 = vmul.f32 1.442695, %v629_v18 }
 0x21c   : > { %v1213_v39 = vpop.eup %1212  ;;  %1218 = vpow2.f32 %v658_v37 }
 0x21d   : > { %737 = vadd.xlane.f32.xlu1 %v712_v38  ;;  %684 = vadd.xlane.f32.xlu0 %v1213_v39  ;;  %v613_v40 = vpop.xlane.xlu0 %612  ;;  %v713_v52 = vmul.f32 %v1213_v39, %v1667_v41 }
 0x21e   : > { %v630_v25 = vsub.f32 %v1653_v33, %v613_v40  ;;  %v1215_v44 = vpop.eup %1214 }
 0x21f   : > { %v615_v42 = vpop.xlane.xlu1 %614  ;;  %v714_v33 = vmul.f32 %v1215_v44, %v1667_v41 }
 0x220   : > { %v660_v45 = vmul.f32 1.442695, %v630_v25  ;;  %v631_v46 = vsub.f32 %v1657_v34, %v615_v42 }
 0x221   : > { %686 = vadd.xlane.f32.xlu1 %v1215_v44 }
 0x222   : > { %1220 = vpow2.f32 %v660_v45  ;;  %v662_v26 = vmul.f32 1.442695, %v631_v46 }
 0x224   : > { %v1217_v47 = vpop.eup %1216  ;;  %1222 = vpow2.f32 %v662_v26 }
 0x225   : > { %688 = vadd.xlane.f32.xlu0 %v1217_v47  ;;  %v715_v34 = vmul.f32 %v1217_v47, %v1667_v41 }
 0x226   : > { %v1219_v36 = vpop.eup %1218 }
 0x227   : > { %690 = vadd.xlane.f32.xlu1 %v1219_v36  ;;  %v716_v43 = vmul.f32 %v1219_v36, %v1667_v41 }
 0x22c   : > { %v1221_v48 = vpop.eup %1220 }
 0x22d   : > { %692 = vadd.xlane.f32.xlu0 %v1221_v48  ;;  %v717_v53 = vmul.f32 %v1221_v48, %v1667_v41 }
 0x22e   : > { %v1223_v50 = vpop.eup %1222 }
 0x22f   : > { %694 = vadd.xlane.f32.xlu1 %v1223_v50  ;;  %v718_v49 = vmul.f32 %v1223_v50, %v1667_v41 }
 0x231   : > { %739 = vadd.xlane.f32.xlu0 %v713_v52 }
 0x233   : > { %741 = vadd.xlane.f32.xlu1 %v714_v33 }
 0x235   : > { %743 = vadd.xlane.f32.xlu0 %v715_v34 }
 0x237   : > { %745 = vadd.xlane.f32.xlu1 %v716_v43 }
 0x239   : > { %747 = vadd.xlane.f32.xlu0 %v717_v53 }
 0x23b   : > { %749 = vadd.xlane.f32.xlu1 %v718_v49 }
 0x282   : > { %v665_v55 = vpop.xlane.xlu0 %664 }
 0x283   : > { %1224 = vrcp.f32 %v665_v55 }
 0x286   : > { %v667_v56 = vpop.xlane.xlu1 %666  ;;  %v720_v51 = vpop.xlane.xlu0 %719 }
 0x287   : > { %1226 = vrcp.f32 %v667_v56 }
 0x28a   : > { %v722_v59 = vpop.xlane.xlu1 %721  ;;  %v669_v60 = vpop.xlane.xlu0 %668 }
 0x28b   : > { %1228 = vrcp.f32 %v669_v60 }
 0x28d   : > { %v1225_v62 = vpop.eup %1224 }
 0x28e   : > { %v671_v61 = vpop.xlane.xlu1 %670  ;;  %v724_v57 = vpop.xlane.xlu0 %723  ;;  %v767_v0 = vmul.f32 %v1225_v62, %v720_v51 }
 0x28f   : > { %1230 = vrcp.f32 %v671_v61 }
 0x291   : > { %v1227_v63 = vpop.eup %1226 }
 0x292   : > { %v768_v3 = vmul.f32 %v1227_v63, %v722_v59  ;;  %v726_v58 = vpop.xlane.xlu1 %725  ;;  %v673_v41 = vpop.xlane.xlu0 %672 }
 0x293   : > { %1232 = vrcp.f32 %v673_v41 }
 0x294   : > { %v784_v4 = vpack.c.bf16 %v768_v3, %v767_v0  ;;  %v1408_v0 = vmov 1966171168  }
 0x295   : > { %v1229_v7 = vpop.eup %1228  ;;  %v853_v3 = vunpack.c.l.s4 %v1408_v0 }
 0x296   : > { %v675_v5 = vpop.xlane.xlu1 %674  ;;  %792 = vxpose.xlu0.c.b16.start [1/8] (narrow) %v784_v4, 16  ;;  %v728_v6 = vpop.xlane.xlu0 %727  ;;  %v769_v8 = vmul.f32 %v1229_v7, %v724_v57 }
 0x297   : > { %1234 = vrcp.f32 %v675_v5  ;;  %v854_v41 = vunpack.c.0.s8 %v853_v3 }
 0x299   : > { %v1231_v1 = vpop.eup %1230 }
 0x29a   : > { %v770_v11 = vmul.f32 %v1231_v1, %v726_v58  ;;  %v730_v12 = vpop.xlane.xlu1 %729  ;;  %v677_v13 = vpop.xlane.xlu0 %676  ;;  %v855_v58 = vlaneseq }
 0x29b   : > { %1236 = vrcp.f32 %v677_v13  ;;  %v783_v13 = vld [vmem:[#allocation7] sm:$0x3] }
 0x29c   : > { %v785_v2 = vpack.c.bf16 %v770_v11, %v769_v8  ;;  %v856_v4 = vshrl.u32 %v855_v58, 7  ;;  %vm870_vm1 = vcmp.lt.s32.totalorder %v855_v58, 256 }
 0x29d   : > { %v1233_v16 = vpop.eup %1232 }
 0x29e   : > { %v679_v14 = vpop.xlane.xlu1 %678  ;;  %793 = vxpose.xlu0.c.b16.cont [2/8] (narrow) %v785_v2, 16  ;;  %v732_v15 = vpop.xlane.xlu0 %731  ;;  %v771_v9 = vmul.f32 %v1233_v16, %v728_v6  ;;  %v857_v6 = vsub.s32 %v854_v41, %v856_v4 }
 0x29f   : > { %1238 = vrcp.f32 %v679_v14 }
 0x2a1   : > { %v1235_v19 = vpop.eup %1234 }
 0x2a2   : > { %v772_v20 = vmul.f32 %v1235_v19, %v730_v12  ;;  %v734_v21 = vpop.xlane.xlu1 %733  ;;  %v681_v22 = vpop.xlane.xlu0 %680 }
 0x2a3   : > { %1240 = vrcp.f32 %v681_v22 }
 0x2a4   : > { %v786_v23 = vpack.c.bf16 %v772_v20, %v771_v9 }
 0x2a5   : > { %v1237_v24 = vpop.eup %1236 }
 0x2a6   : > { %v683_v10 = vpop.xlane.xlu1 %682  ;;  %794 = vxpose.xlu0.c.b16.cont [3/8] (narrow) %v786_v23, 16  ;;  %v773_v28 = vmul.f32 %v1237_v24, %v732_v15  ;;  %v736_v30 = vpop.xlane.xlu0 %735 }
 0x2a7   : > { %1242 = vrcp.f32 %v683_v10 }
 0x2a9   : > { %v1239_v27 = vpop.eup %1238 }
 0x2aa   : > { %v774_v29 = vmul.f32 %v1239_v27, %v734_v21  ;;  %v738_v31 = vpop.xlane.xlu1 %737  ;;  %v685_v38 = vpop.xlane.xlu0 %684 }
 0x2ab   : > { %1244 = vrcp.f32 %v685_v38 }
 0x2ac   : > { %v787_v17 = vpack.c.bf16 %v774_v29, %v773_v28 }
 0x2ad   : > { %v1241_v32 = vpop.eup %1240 }
 0x2ae   : > { %795 = vxpose.xlu0.c.b16.cont [4/8] (narrow) %v787_v17, 16  ;;  %v775_v18 = vmul.f32 %v1241_v32, %v736_v30  ;;  %v687_v39 = vpop.xlane.xlu1 %686 }
 0x2af   : > { %1246 = vrcp.f32 %v687_v39 }
 0x2b1   : > { %v1243_v35 = vpop.eup %1242 }
 0x2b2   : > { %v776_v37 = vmul.f32 %v1243_v35, %v738_v31  ;;  %v689_v25 = vpop.xlane.xlu0 %688 }
 0x2b3   : > { %1248 = vrcp.f32 %v689_v25 }
 0x2b4   : > { %v788_v40 = vpack.c.bf16 %v776_v37, %v775_v18  ;;  %v691_v42 = vpop.xlane.xlu1 %690 }
 0x2b5   : > { %1250 = vrcp.f32 %v691_v42  ;;  %v1245_v26 = vpop.eup %1244 }
 0x2b6   : > { %796 = vxpose.xlu0.c.b16.cont [5/8] (narrow) %v788_v40, 16 }
 0x2b9   : > { %v1247_v47 = vpop.eup %1246 }
 0x2ba   : > { %v693_v44 = vpop.xlane.xlu0 %692 }
 0x2bb   : > { %1252 = vrcp.f32 %v693_v44 }
 0x2bc   : > { %v695_v45 = vpop.xlane.xlu1 %694 }
 0x2bd   : > { %1254 = vrcp.f32 %v695_v45  ;;  %v1249_v33 = vpop.eup %1248 }
 0x2be   : > { %v740_v46 = vpop.xlane.xlu0 %739 }
 0x2bf   : > { %v777_v48 = vmul.f32 %v1245_v26, %v740_v46  ;;  %v1251_v43 = vpop.eup %1250 }
 0x2c0   : > { %v742_v36 = vpop.xlane.xlu1 %741 }
 0x2c1   : > { %v778_v50 = vmul.f32 %v1247_v47, %v742_v36 }
 0x2c2   : > { %v744_v52 = vpop.xlane.xlu0 %743 }
 0x2c3   : > { %v789_v34 = vpack.c.bf16 %v778_v50, %v777_v48  ;;  %v779_v49 = vmul.f32 %v1249_v33, %v744_v52 }
 0x2c4   : > { %v746_v53 = vpop.xlane.xlu1 %745 }
 0x2c5   : > { %v780_v54 = vmul.f32 %v1251_v43, %v746_v53  ;;  %797 = vxpose.xlu0.c.b16.cont [6/8] (narrow) %v789_v34, 16  ;;  %v1253_v55 = vpop.eup %1252 }
 0x2c6   : > { %v748_v56 = vpop.xlane.xlu0 %747 }
 0x2c7   : > { %v1255_v51 = vpop.eup %1254  ;;  %v790_v59 = vpack.c.bf16 %v780_v54, %v779_v49  ;;  %v781_v61 = vmul.f32 %v1253_v55, %v748_v56 }
 0x2c8   : > { %v750_v60 = vpop.xlane.xlu1 %749 }
 0x2c9   : > { %v782_v57 = vmul.f32 %v1255_v51, %v750_v60  ;;  %798 = vxpose.xlu0.c.b16.cont [7/8] (narrow) %v790_v59, 16 }
 0x2cb   : > { %v791_v62 = vpack.c.bf16 %v782_v57, %v781_v61 }
 0x2cd   : > { %799 = vxpose.xlu0.c.b16.end [8/8] (narrow) %v791_v62, 16 }
 0x317   : > { %v800_v63 = vpop.trf.xlu0 }
 0x318   : > { %841 = vmatmul.mubr.bf16.vlgmr.msra.gmra.mrb[0].mxu1 %v800_v63 }
 0x3eb   : > { %v842_v5 = vpop.f32.mrb[0].mxu1 }
 0x3ec   : > { %v844_v7 = vpop.f32.mrb[1].mxu1 }
 0x3ed   : > { %v851_v1 = vcombine.low %v842_v5, %v844_v7  ;;  %v846_v8 = vpop.f32.mrb[2].mxu1 }
 0x3ee   : > { %v847_v11 = vpop.f32.mrb[3].mxu1 }
 0x3ef   : > { %v858_v12 = vrot.slane %v851_v1, %v857_v6 }
 0x3f1   : > { %v865_v2 = vrot.slane %v858_v12, %v857_v6 }
 0x3f3   : > { %v867_v14 = vadd.f32 %v865_v2, %v783_v13 }
 0x3f5   : > { %872 = vst.msk [vmem:[#allocation7] sm:$0x3] %vm870_vm1, %v867_v14 }
 0x3f6   : > { %1327 = shalt.err (!%p1324_p13)
}
 0x3f7   : > { %s1328_s21 = scalar_lea.hbm %s1747_s4, 32 }
 0x3f8   : > { %p1329_p2 = scmp.ne.s32.totalorder %s1747_s4, %s1328_s21  ;;  %p1334_p0 = scmp.lt.u32.totalorder %s1328_s21, %s1747_s4 }
 0x3fa   : > { %p1330_p3 = pnand %p1329_p2, %p1699_p1 }
 0x3fc   : > { %p1331_p12 = pneg %p1330_p3 }
 0x3fe   : > { %p1336_p6 = pnand %p1334_p0, %p1331_p12 }
 0x400   : > { %1339 = shalt.err (!%p1336_p6)
}
 0x401   : > { %1079 = dma.vmem_to_hbm [thread:$0]  (%p1699_p1), %s884_s9, 32, %s1747_s4, [#allocation4]  }
 0x402   : > { %1373 = dma.done.wait (%p1699_p1), [#allocation4], 32  }
 0x403   : > { %1375 = vsyncadd (%p1699_p1), [#allocation4], 4294967264 }
 0x404 PF: > { %s19_s20 = sadd.s32 1, %s1398_s20   ;;  %s1761_s15 = smov %s1382_s16 }
 0x405   : > { %p16_p7 = scmp.ge.s32.totalorder %s19_s20, 6   ;;  %s1762_s16 = smov %s1386_s17 }
 0x406   : > { %s1763_s17 = smov %s1520_s6  ;;  %s1764_s18 = smov %s1394_s19 }
 0x407   : > { %s1765_s19 = smov %s1767_s28  ;;  %18 = sbr.rel (!%p16_p7) target bundleno = 6 (0x6), region = 82 }
 0x40e   :  { %896 = vsyncpa [#allocation3], 1 }
 0x40f   :  { %898 = vsyncpa [#allocation3 + $0x1], 1 }
 0x410   :  { %899 = vsyncpa [#allocation6], 1 }
 0x411   :  { %900 = vsyncpa [#allocation4], 1 }
 0x412   :  { %902 = vsyncpa [#allocation4 + $0x1], 1 }

</bundles_post_ra>
